<compile_context>
chip_gen: v5e
topology: v5e:2x2
jax: 0.10.0
libtpu: 0.0.40
codegen_flags: <defaults>
</compile_context>

<pallas_src>
import jax
import jax.numpy as jnp
from jax.experimental import pallas as pl
from jax.experimental.pallas import tpu as pltpu

IN_FEATURES = 10
OUT_FEATURES = 11
OUT_PAD = 16            # narrow lane-padded output width (kernel is store-bound)
DEFAULT_TILE_N = 4096   # rows per grid step (multiple of 8)


def _round_up(n, m):
    return ((n + m - 1) // m) * m


def linear_kernel(x_ref, wt_ref, b_ref, out_ref):
    # x_ref:  (TILE_N, 10)      f32
    # wt_ref: (10, OUT_PAD)     f32  (pre-transposed + zero-padded)
    # b_ref:  (1, OUT_PAD)      f32  (zero-padded)
    # out_ref:(TILE_N, OUT_PAD) f32
    out_ref[...] = (
        jnp.dot(x_ref[...], wt_ref[...], preferred_element_type=jnp.float32)
        + b_ref[...]
    ).astype(out_ref.dtype)


def model_forward(x, w, b, *, tile_n=DEFAULT_TILE_N):
    """x: (N, 10) f32, w: (11, 10) f32, b: (11,) f32 -> (N, 2, 11) f32."""
    n, k = x.shape
    assert k == IN_FEATURES

    x = x.astype(jnp.float32)

    # Pre-transpose + pad params once in the wrapper (no in-kernel transpose).
    w_t = jnp.transpose(w).astype(jnp.float32)  # (10, 11)
    w_pad = (
        jnp.zeros((IN_FEATURES, OUT_PAD), jnp.float32)
        .at[:, :OUT_FEATURES].set(w_t)
    )
    b_pad = (
        jnp.zeros((1, OUT_PAD), jnp.float32)
        .at[:, :OUT_FEATURES].set(b.astype(jnp.float32).reshape(1, OUT_FEATURES))
    )

    # Row tile: no x padding/copy. Pallas masks the partial last block; the
    # unspecified tail rows produce garbage outputs that are never consumed.
    if n <= 32:
        tile = n  # single block; dims equal full array dims -> no (8,128) rule
    else:
        # Keep >= ~4 grid steps for the v7x megacore split, cap at tile_n,
        # block second-minor dim a multiple of 8.
        tile = max(8, min(tile_n, _round_up(pl.cdiv(n, 4), 8)))
    grid = (pl.cdiv(n, tile),)

    flops = 2 * n * IN_FEATURES * OUT_FEATURES
    bytes_accessed = (
        n * IN_FEATURES * 4                 # x read
        + (IN_FEATURES + 1) * OUT_PAD * 4   # weight + bias read
        + n * OUT_PAD * 4                   # output write
    )

    y_pad = pl.pallas_call(
        linear_kernel,
        out_shape=jax.ShapeDtypeStruct((n, OUT_PAD), jnp.float32),
        grid_spec=pltpu.PrefetchScalarGridSpec(
            num_scalar_prefetch=0,
            grid=grid,
            in_specs=[
                pl.BlockSpec((tile, IN_FEATURES), lambda i: (i, 0)),
                pl.BlockSpec((IN_FEATURES, OUT_PAD), lambda i: (0, 0)),
                pl.BlockSpec((1, OUT_PAD), lambda i: (0, 0)),
            ],
            out_specs=pl.BlockSpec((tile, OUT_PAD), lambda i: (i, 0)),
        ),
        compiler_params=pltpu.CompilerParams(
            dimension_semantics=("parallel",),   # v7x: split rows over 2 TCs
            vmem_limit_bytes=32 << 20,           # safe on v7x's 64 MiB VMEM
        ),
        cost_estimate=pl.CostEstimate(
            flops=flops, transcendentals=0, bytes_accessed=bytes_accessed
        ),
    )(x, w_pad, b_pad)

    # Slice away lane padding; stack((y, y), dim=1) + identity [...] is a
    # free, fusion-friendly broadcast outside the kernel.
    y = y_pad[:, :OUT_FEATURES]
    return jnp.broadcast_to(y[:, None, :], (n, 2, OUT_FEATURES))


if __name__ == "__main__":
    key = jax.random.PRNGKey(0)
    kx, kw, kb = jax.random.split(key, 3)

    # Deterministic parameter init (shapes from nn.Linear(10, 11)).
    bound = 1.0 / (IN_FEATURES ** 0.5)
    w = jax.random.uniform(
        kw, (OUT_FEATURES, IN_FEATURES), jnp.float32, -bound, bound
    )
    b = jax.random.uniform(kb, (OUT_FEATURES,), jnp.float32, -bound, bound)

    # Small input batch consistent with the forward pass: (N, 10).
    x = jax.random.normal(kx, (4, IN_FEATURES), jnp.float32)

    out = model_forward(x, w, b)
    jax.block_until_ready(out)

    # Reference check in plain JAX.
    y_ref = x @ w.T + b
    ref = jnp.stack((y_ref, y_ref), axis=1)
    assert out.shape == (4, 2, OUT_FEATURES)
    assert jnp.allclose(out, ref, atol=1e-5, rtol=1e-5)

    print("KERNEL_OK")
</pallas_src>

<mosaic_0001>
module attributes {stable_mosaic.version = 11 : i64} {
  func.func @linear_kernel(%arg0: i32, %arg1: memref<4x10xf32, #tpu.memory_space<vmem>>, %arg2: memref<10x16xf32, #tpu.memory_space<vmem>>, %arg3: memref<1x16xf32, #tpu.memory_space<vmem>>, %arg4: memref<4x16xf32, #tpu.memory_space<vmem>>) attributes {dimension_semantics = [#tpu.dimension_semantics<parallel>], iteration_bounds = array<i64: 1>, scalar_prefetch = 0 : i64, scratch_operands = 0 : i64, tpu.core_type = #tpu.core_type<tc>, window_params = [{transform_indices = @transform_0, window_bounds = array<i64: 4, 10>}, {pipeline_mode = #tpu.pipeline_mode<synchronous>, transform_indices = @transform_1, window_bounds = array<i64: 10, 16>}, {pipeline_mode = #tpu.pipeline_mode<synchronous>, transform_indices = @transform_2, window_bounds = array<i64: 1, 16>}, {transform_indices = @transform_3, window_bounds = array<i64: 4, 16>}]} {
    %c0 = arith.constant 0 : index
    %c0_0 = arith.constant 0 : index
    %0 = vector.load %arg1[%c0, %c0_0] : memref<4x10xf32, #tpu.memory_space<vmem>>, vector<4x10xf32>
    %c0_1 = arith.constant 0 : index
    %c0_2 = arith.constant 0 : index
    %1 = vector.load %arg2[%c0_1, %c0_2] : memref<10x16xf32, #tpu.memory_space<vmem>>, vector<10x16xf32>
    %cst = arith.constant dense<0.000000e+00> : vector<4x16xf32>
    %2 = tpu.matmul %0, %1, %cst {dimension_numbers = #tpu.dot_dimension_numbers<[1], [0], [0], [1], [0, 0, 1, 1], [], []>} : vector<4x10xf32>, vector<10x16xf32>, vector<4x16xf32> -> vector<4x16xf32>
    %c0_3 = arith.constant 0 : index
    %c0_4 = arith.constant 0 : index
    %3 = vector.load %arg3[%c0_3, %c0_4] : memref<1x16xf32, #tpu.memory_space<vmem>>, vector<1x16xf32>
    %4 = vector.broadcast %3 : vector<1x16xf32> to vector<4x16xf32>
    %5 = arith.addf %2, %4 : vector<4x16xf32>
    %c0_5 = arith.constant 0 : index
    %c0_6 = arith.constant 0 : index
    %6 = vector.load %arg4[%c0_5, %c0_6] : memref<4x16xf32, #tpu.memory_space<vmem>>, vector<4x16xf32>
    tpu.vector_store %arg4[%c0_5, %c0_6], %5 {strides = array<i32>} : memref<4x16xf32, #tpu.memory_space<vmem>>, vector<4x16xf32>,
    return
  }
  func.func @transform_0(%arg0: i32) -> (i32, i32) {
    %c0_i32 = arith.constant 0 : i32
    %c0_i32_0 = arith.constant 0 : i32
    return %arg0, %c0_i32 : i32, i32
  }
  func.func @transform_1(%arg0: i32) -> (i32, i32) {
    %c0_i32 = arith.constant 0 : i32
    %c0_i32_0 = arith.constant 0 : i32
    %c0_i32_1 = arith.constant 0 : i32
    return %c0_i32, %c0_i32_0 : i32, i32
  }
  func.func @transform_2(%arg0: i32) -> (i32, i32) {
    %c0_i32 = arith.constant 0 : i32
    %c0_i32_0 = arith.constant 0 : i32
    %c0_i32_1 = arith.constant 0 : i32
    return %c0_i32, %c0_i32_0 : i32, i32
  }
  func.func @transform_3(%arg0: i32) -> (i32, i32) {
    %c0_i32 = arith.constant 0 : i32
    %c0_i32_0 = arith.constant 0 : i32
    return %arg0, %c0_i32 : i32, i32
  }
}

</mosaic_0001>

<bundles_post_ra>
// kernel: tpu_custom_call.1
= control target key start
LH: loop header
LB: loop body
LE: loop exit
PB: predicated region body
PF: predicated region fallthrough
CT: control target
= control target key end

     0   :  { %8 = vsyncpa [#allocation3], 0  ;;  %s223_s0 = inlined_call_operand.hbm [shape: f32[4,10], index: 0, kind: input, shape index: {}]   ;;  %s224_s1 = inlined_call_operand.hbm [shape: f32[10,16], index: 1, kind: input, shape index: {}]   ;;  %s225_s2 = inlined_call_operand.vmem [shape: f32[1,16], index: 2, kind: input, shape index: {}]   ;;  %s226_s3 = inlined_call_operand.hbm [shape: f32[4,16], index: 3, kind: output, shape index: {}]  }
   0x1   :  { %9 = vsyncpa [#allocation6], 0 }
   0x2   :  { %10 = vsyncpa [#allocation4], 0  ;;  %s16_s14 = sshll.u32 %s223_s0, 4  ;;  %s186_s15 = smov [#allocation2]   ;;  %s17_s14 = int_to_ptr.hbm [resolvable:$true] %s16_s14 }
   0x3   :  { %s18_s16 = sshll.u32 %s186_s15, 4  ;;  %s26_s19 = sshll.u32 %s224_s1, 4  ;;  %s19_s16 = int_to_ptr.vmem [resolvable:$true] %s18_s16  ;;  %s27_s19 = int_to_ptr.hbm [resolvable:$true] %s26_s19 }
   0x4   :  { %21 = dma.hbm_to_vmem [thread:$0]  %s17_s14, 64, %s19_s16, [#allocation3]  }
   0x5   :  { %s187_s20 = smov [#allocation5]   ;;  %s188_s22 = smov 128  }
   0x6   :  { %s28_s21 = sshll.u32 %s187_s20, 4  ;;  %s189_s23 = smov 8   ;;  %s29_s21 = int_to_ptr.vmem [resolvable:$true] %s28_s21 }
   0x7   :  { %34 = dma.hbm_to_vmem [thread:$0]  %s27_s19, 256, %s29_s21, [#allocation6], %s188_s22, %s188_s22, %s189_s23  }
   0x8   :  { %180 = dma.done.wait [#allocation3], 64  }
   0x9   :  { %181 = vsyncadd [#allocation3], 4294967232 }
   0xa   :  { %182 = dma.done.wait [#allocation6], 256  }
   0xb   :  { %183 = vsyncadd [#allocation6], 4294967040  ;;  %vm56_vm0 = vcmask 1041408   ;;  %v47_v0 = vld [vmem:[#allocation5 + $0x8] sm:$0x3]  ;;  %v46_v1 = vld [vmem:[#allocation5] sm:$0xff] }
   0xc   :  { %100 = vmatpush.msk.msra.mxu0 %vm56_vm0, %v47_v0  ;;  %v45_v2 = vld [vmem:[#allocation2] sm:$0xf]  ;;  %vm52_vm1 = vcmask 80896   ;;  %s190_s24 = smov [#allocation7]   ;;  %s89_s28 = sshll.u32 %s226_s3, 4  ;;  %vm80_vm2 = vcmask 125952   ;;  %s90_s28 = int_to_ptr.hbm [resolvable:$true] %s89_s28 }
   0xd   :  { %v107_v3 = vld [vmem:[%s225_s2] ss:$0 sm:$0xff]  ;;  %s87_s25 = sshll.u32 %s190_s24, 4  ;;  %s88_s25 = int_to_ptr.vmem [resolvable:$true] %s87_s25 }
   0xe   :  { %75 = vmatpush.msra.mxu0 %v46_v1 }
   0xf   :  { %101 = vmatmul.msk.f32.vlgmr.msra.gmra.mxu0 %vm52_vm1, %v45_v2 }
  0x8c   :  { %v77_v4 = vpop.f32.mrf.mxu0 }
  0x8d   :  { %v78_v5 = vadd.f32 %v107_v3, %v77_v4 }
  0x8f   :  { %81 = vst.msk [vmem:[#allocation7] sm:$0xf] %vm80_vm2, %v78_v5 }
  0x90   :  { %92 = dma.vmem_to_hbm [thread:$0]  %s88_s25, 64, %s90_s28, [#allocation4]  }
  0x91   :  { %184 = dma.done.wait [#allocation4], 64  }
  0x92   :  { %185 = vsyncadd [#allocation4], 4294967232 }
  0x93   :  { %97 = vsyncpa [#allocation3], 1 }
  0x94   :  { %98 = vsyncpa [#allocation6], 1 }
  0x95   :  { %99 = vsyncpa [#allocation4], 1 }

</bundles_post_ra>
